<compile_context>
chip_gen: v7x
topology: tpu7x:2x2x1
jax: 0.10.0
libtpu: 0.0.40
codegen_flags: <defaults>
</compile_context>

<pallas_src>
import jax
import jax.numpy as jnp
from jax.experimental import pallas as pl
from jax.experimental.pallas import tpu as pltpu


def _round_up(x, m):
    return ((x + m - 1) // m) * m


def _pick_col_tile(total, cap, unit=128):
    # largest multiple of `unit` that divides `total` and is <= cap (total % unit == 0)
    best = unit
    t = unit
    while t <= min(total, max(cap, unit)):
        if total % t == 0:
            best = t
        t += unit
    return best


def _vmem_limit(need_bytes):
    try:
        phys = int(pltpu.get_tpu_info().vmem_capacity_bytes)
    except Exception:
        phys = 64 << 20                      # conservative fallback (v7x per-TC)
    hi = min(phys - (8 << 20), int(phys * 0.85))   # leave headroom for Mosaic scratch
    return int(max(min(need_bytes + (4 << 20), hi), min(32 << 20, hi)))


# ------------------- generic parallel matmul + bias kernel (kernels A & C) -------------------

def _mm_bias_kernel(x_ref, w_ref, b_ref, o_ref):
    o_ref[...] = (
        jnp.dot(x_ref[...], w_ref[...], preferred_element_type=jnp.float32)
        + b_ref[...]
    )


def _matmul_bias(x, w, b, *, row_cap=512, col_cap=1024):
    """x: (M, K) f32, w: (K, N) f32, b: (1, N) f32; K, N multiples of 128."""
    M, K = x.shape
    N = w.shape[1]
    TM = min(_round_up(M, 8), _round_up(row_cap, 8))
    Mp = _round_up(M, TM)
    TN = _pick_col_tile(N, col_cap)
    if Mp != M:
        x = jnp.zeros((Mp, K), x.dtype).at[:M].set(x)
    need = 4 * 2 * (TM * K + K * TN + TN + TM * TN)   # double-buffered blocks
    out = pl.pallas_call(
        _mm_bias_kernel,
        out_shape=jax.ShapeDtypeStruct((Mp, N), jnp.float32),
        grid_spec=pltpu.PrefetchScalarGridSpec(
            num_scalar_prefetch=0,
            # columns OUTER, rows INNER -> every (K, TN) weight tile is fetched exactly once
            grid=(N // TN, Mp // TM),
            in_specs=[
                pl.BlockSpec((TM, K), lambda j, i: (i, 0)),
                pl.BlockSpec((K, TN), lambda j, i: (0, j)),
                pl.BlockSpec((1, TN), lambda j, i: (0, j)),
            ],
            out_specs=pl.BlockSpec((TM, TN), lambda j, i: (i, j)),
        ),
        compiler_params=pltpu.CompilerParams(
            dimension_semantics=("parallel", "parallel"),
            vmem_limit_bytes=_vmem_limit(need),
        ),
    )(x, w, b)
    return out[:M]


# --------------------------- recurrent multi-layer LSTM kernel (B) ---------------------------

def _make_lstm_kernel(num_layers, hidden_pad, steps_per_block):
    HP = hidden_pad
    L = num_layers

    def kernel(pg_ref, w_hbm, b_ref, out_ref, w_vmem, h_ref, c_ref, dma_sem):
        # grid = (batch_tile [parallel], time_block [arbitrary]); time is innermost.
        @pl.when(pl.program_id(1) == 0)
        def _():
            # fresh (h, c) per batch tile; load ALL recurrent weights once into a
            # single-buffered VMEM scratch (they live in HBM via memory_space=pl.ANY).
            h_ref[...] = jnp.zeros_like(h_ref)
            c_ref[...] = jnp.zeros_like(c_ref)
            cp = pltpu.make_async_copy(w_hbm, w_vmem, dma_sem.at[0])
            cp.start()
            cp.wait()

        def cell(gates, l):
            i_g = jax.nn.sigmoid(gates[:, 0 * HP:1 * HP])
            f_g = jax.nn.sigmoid(gates[:, 1 * HP:2 * HP])
            g_g = jnp.tanh(gates[:, 2 * HP:3 * HP])
            o_g = jax.nn.sigmoid(gates[:, 3 * HP:4 * HP])
            c_new = f_g * c_ref[l] + i_g * g_g
            h_new = o_g * jnp.tanh(c_new)
            h_ref[l] = h_new
            c_ref[l] = c_new
            return h_new

        # TS local timesteps per grid step (statically unrolled).
        for s in range(steps_per_block):
            # layer 0: input contribution (x @ W_ih0 + b0) precomputed outside -> only
            # the recurrent matmul stays on the serial path.
            gates0 = pg_ref[s] + jnp.dot(
                h_ref[0], w_vmem[0], preferred_element_type=jnp.float32)
            x = cell(gates0, 0)
            for l in range(1, L):
                # two dots into the same accumulator; biases pre-broadcast to (BT, 4Hp)
                gates = (
                    b_ref[l - 1]
                    + jnp.dot(x, w_vmem[2 * l - 1], preferred_element_type=jnp.float32)
                    + jnp.dot(h_ref[l], w_vmem[2 * l], preferred_element_type=jnp.float32)
                )
                x = cell(gates, l)
            out_ref[s] = x                       # top-layer hidden state

    return kernel


# ----------------------------------------- wrapper -----------------------------------------

def decoder_forward_pallas(features, captions, params, *,
                           steps_per_block=8, row_tile=512, vocab_tile=1024):
    """features: (B, E) f32; captions: (T_cap, B) int32.  Returns (T_cap+1, B, V) f32."""
    embed = params["embed"]            # (V, E)
    lstm = params["lstm"]              # list of (w_ih (4H,in), w_hh (4H,H), b_ih, b_hh)
    w_lin = params["w_lin"]            # (V, H)
    b_lin = params["b_lin"]            # (V,)

    B, E = features.shape
    T = captions.shape[0] + 1
    H = lstm[0][1].shape[1]
    V = w_lin.shape[0]
    L = len(lstm)

    # ---- pad to vreg / MXU friendly shapes ----
    Bp = _round_up(B, 8)
    Ep = _round_up(E, 128)
    Hp = _round_up(H, 128)
    Vp = _round_up(V, 128)

    n_tblocks = max(1, -(-T // steps_per_block))       # ceil
    TS = -(-T // n_tblocks)                            # balanced -> minimal time padding
    Tp = n_tblocks * TS

    n_btiles = 2 if (Bp >= 16 and Bp % 16 == 0) else 1   # v7x: 2 TCs split the batch
    BT = Bp // n_btiles

    # ---- glue: embedding gather + dropout (eval mode == identity) ----
    # TODO(synk): training-mode Dropout(p=0.5) after the embedding is not applied (eval mode).
    emb = embed[captions].astype(jnp.float32)                       # (T_cap, B, E)
    x_seq = jnp.concatenate([features[None].astype(jnp.float32), emb], axis=0)   # (T, B, E)
    x_pad = jnp.zeros((Tp, Bp, Ep), jnp.float32).at[:T, :B, :E].set(x_seq)

    # ---- pack + pad weights: gate blocks Hp-wide so in-kernel slices are lane aligned;
    #      padded lanes are all-zero and never contaminate real lanes.
    def pack_wT(w, in_dim, in_pad):
        out = jnp.zeros((in_pad, 4 * Hp), jnp.float32)
        for g in range(4):
            out = out.at[:in_dim, g * Hp:g * Hp + H].set(w[g * H:(g + 1) * H, :].T)
        return out

    def pack_bias(b_ih, b_hh):
        out = jnp.zeros((4 * Hp,), jnp.float32)
        for g in range(4):
            out = out.at[g * Hp:g * Hp + H].set(
                b_ih[g * H:(g + 1) * H] + b_hh[g * H:(g + 1) * H])
        return out

    w_ih0, w_hh0, b_ih0, b_hh0 = lstm[0]
    w_ih0_p = pack_wT(w_ih0, E, Ep)                      # (Ep, 4Hp)  -> used only in kernel A
    bias0_p = pack_bias(b_ih0, b_hh0)[None, :]           # (1, 4Hp)

    w_blocks = [pack_wT(w_hh0, H, Hp)]                   # idx 0      : W_hh layer 0
    bias_rows = []
    for l in range(1, L):
        w_ih, w_hh, b_ih, b_hh = lstm[l]
        w_blocks.append(pack_wT(w_ih, H, Hp))            # idx 2l - 1 : W_ih layer l
        w_blocks.append(pack_wT(w_hh, H, Hp))            # idx 2l     : W_hh layer l
        bias_rows.append(pack_bias(b_ih, b_hh))
    w_stack = jnp.stack(w_blocks)                        # (2L-1, Hp, 4Hp), stays in HBM
    if bias_rows:
        b_stack = jnp.broadcast_to(jnp.stack(bias_rows)[:, None, :],
                                   (L - 1, BT, 4 * Hp)) + 0.0   # pre-broadcast (no in-kernel bcast)
    else:
        b_stack = jnp.zeros((1, BT, 4 * Hp), jnp.float32)       # dummy, never read when L == 1

    # ---- kernel A: layer-0 input pre-gates for all timesteps (fully parallel matmul) ----
    pregates = _matmul_bias(x_pad.reshape(Tp * Bp, Ep), w_ih0_p, bias0_p,
                            row_cap=row_tile, col_cap=1024)
    pregates = pregates.reshape(Tp, Bp, 4 * Hp)

    # ---- kernel B: sequential recurrence over time ----
    lstm_kernel = _make_lstm_kernel(L, Hp, TS)
    need_rec = 4 * (
        2 * TS * BT * 4 * Hp          # pregates blocks (double-buffered)
        + 2 * TS * BT * Hp            # output blocks (double-buffered)
        + 2 * int(b_stack.size)       # biases (tiny, double-buffered)
        + int(w_stack.size)           # weights: single-buffered VMEM scratch
        + 2 * L * BT * Hp             # h / c scratch
    )
    hiddens = pl.pallas_call(
        lstm_kernel,
        out_shape=jax.ShapeDtypeStruct((Tp, Bp, Hp), jnp.float32),
        grid_spec=pltpu.PrefetchScalarGridSpec(
            num_scalar_prefetch=0,
            grid=(n_btiles, n_tblocks),
            in_specs=[
                pl.BlockSpec((TS, BT, 4 * Hp), lambda b, t: (t, b, 0)),
                pl.BlockSpec(memory_space=pl.ANY),           # stacked weights: raw HBM ref
                pl.BlockSpec(b_stack.shape, lambda b, t: (0, 0, 0)),
            ],
            out_specs=pl.BlockSpec((TS, BT, Hp), lambda b, t: (t, b, 0)),
            scratch_shapes=[
                pltpu.VMEM(w_stack.shape, jnp.float32),      # single-buffered weights
                pltpu.VMEM((L, BT, Hp), jnp.float32),        # h state
                pltpu.VMEM((L, BT, Hp), jnp.float32),        # c state
                pltpu.SemaphoreType.DMA((1,)),
            ],
        ),
        compiler_params=pltpu.CompilerParams(
            dimension_semantics=("parallel", "arbitrary"),   # batch tiles || , time serial
            vmem_limit_bytes=_vmem_limit(need_rec),
        ),
    )(pregates, w_stack, b_stack)

    # ---- kernel C: vocab projection on REAL rows only (padding compacted away) ----
    h_rows = hiddens[:T, :B, :].reshape(T * B, Hp)
    w_lin_p = jnp.zeros((Hp, Vp), jnp.float32).at[:H, :V].set(w_lin.T)
    b_lin_p = jnp.zeros((1, Vp), jnp.float32).at[0, :V].set(b_lin)
    logits = _matmul_bias(h_rows, w_lin_p, b_lin_p, row_cap=row_tile, col_cap=vocab_tile)
    return logits[:, :V].reshape(T, B, V)


# ------------------------------------- pure-JAX reference -------------------------------------

def decoder_forward_ref(features, captions, params):
    embed = params["embed"]
    lstm = params["lstm"]
    w_lin = params["w_lin"]
    b_lin = params["b_lin"]

    emb = embed[captions]
    x_seq = jnp.concatenate([features[None], emb], axis=0)
    B = features.shape[0]
    H = lstm[0][1].shape[1]
    num_layers = len(lstm)

    def step(carry, x_t):
        hs, cs = carry
        new_hs, new_cs = [], []
        inp = x_t
        for l, (w_ih, w_hh, b_ih, b_hh) in enumerate(lstm):
            gates = inp @ w_ih.T + hs[l] @ w_hh.T + b_ih + b_hh
            i_g = jax.nn.sigmoid(gates[:, 0 * H:1 * H])
            f_g = jax.nn.sigmoid(gates[:, 1 * H:2 * H])
            g_g = jnp.tanh(gates[:, 2 * H:3 * H])
            o_g = jax.nn.sigmoid(gates[:, 3 * H:4 * H])
            c_new = f_g * cs[l] + i_g * g_g
            h_new = o_g * jnp.tanh(c_new)
            new_hs.append(h_new)
            new_cs.append(c_new)
            inp = h_new
        return (jnp.stack(new_hs), jnp.stack(new_cs)), inp

    init = (jnp.zeros((num_layers, B, H)), jnp.zeros((num_layers, B, H)))
    _, hiddens = jax.lax.scan(step, init, x_seq)
    return hiddens @ w_lin.T + b_lin


def init_params(key, embed_size, hidden_size, vocab_size, num_layers):
    keys = jax.random.split(key, 4 + 4 * num_layers)
    k = iter(keys)
    params = {
        "embed": jax.random.normal(next(k), (vocab_size, embed_size), jnp.float32) * 0.1
    }
    lstm = []
    for l in range(num_layers):
        in_dim = embed_size if l == 0 else hidden_size
        w_ih = jax.random.normal(next(k), (4 * hidden_size, in_dim), jnp.float32) * 0.1
        w_hh = jax.random.normal(next(k), (4 * hidden_size, hidden_size), jnp.float32) * 0.1
        b_ih = jax.random.normal(next(k), (4 * hidden_size,), jnp.float32) * 0.1
        b_hh = jax.random.normal(next(k), (4 * hidden_size,), jnp.float32) * 0.1
        lstm.append((w_ih, w_hh, b_ih, b_hh))
    params["lstm"] = lstm
    params["w_lin"] = jax.random.normal(next(k), (vocab_size, hidden_size), jnp.float32) * 0.1
    params["b_lin"] = jax.random.normal(next(k), (vocab_size,), jnp.float32) * 0.1
    return params


if __name__ == "__main__":
    embed_size, hidden_size, vocab_size, num_layers = 32, 32, 64, 2
    batch, seq = 4, 8

    key = jax.random.PRNGKey(0)
    k_params, k_feat, k_cap = jax.random.split(key, 3)

    params = init_params(k_params, embed_size, hidden_size, vocab_size, num_layers)
    features = jax.random.normal(k_feat, (batch, embed_size), jnp.float32)
    captions = jax.random.randint(k_cap, (seq, batch), 0, vocab_size, jnp.int32)

    out = decoder_forward_pallas(features, captions, params)
    out = jax.block_until_ready(out)

    ref = decoder_forward_ref(features, captions, params)
    assert out.shape == (seq + 1, batch, vocab_size), out.shape
    assert jnp.allclose(out, ref, atol=1e-4, rtol=1e-4), float(jnp.max(jnp.abs(out - ref)))

    print("KERNEL_OK")
</pallas_src>

<mosaic_0001>
module attributes {stable_mosaic.version = 11 : i64} {
  func.func @_mm_bias_kernel(%arg0: i32, %arg1: i32, %arg2: memref<80x128xf32, #tpu.memory_space<vmem>>, %arg3: memref<128x512xf32, #tpu.memory_space<vmem>>, %arg4: memref<1x512xf32, #tpu.memory_space<vmem>>, %arg5: memref<80x512xf32, #tpu.memory_space<vmem>>) attributes {dimension_semantics = [#tpu.dimension_semantics<parallel>, #tpu.dimension_semantics<parallel>], iteration_bounds = array<i64: 1, 1>, scalar_prefetch = 0 : i64, scratch_operands = 0 : i64, tpu.core_type = #tpu.core_type<tc>, window_params = [{transform_indices = @transform_0, window_bounds = array<i64: 80, 128>}, {transform_indices = @transform_1, window_bounds = array<i64: 128, 512>}, {transform_indices = @transform_2, window_bounds = array<i64: 1, 512>}, {transform_indices = @transform_3, window_bounds = array<i64: 80, 512>}]} {
    %c0 = arith.constant 0 : index
    %c0_0 = arith.constant 0 : index
    %0 = vector.load %arg2[%c0, %c0_0] : memref<80x128xf32, #tpu.memory_space<vmem>>, vector<80x128xf32>
    %c0_1 = arith.constant 0 : index
    %c0_2 = arith.constant 0 : index
    %1 = vector.load %arg3[%c0_1, %c0_2] : memref<128x512xf32, #tpu.memory_space<vmem>>, vector<128x512xf32>
    %cst = arith.constant dense<0.000000e+00> : vector<80x512xf32>
    %2 = tpu.matmul %0, %1, %cst {dimension_numbers = #tpu.dot_dimension_numbers<[1], [0], [0], [1], [0, 0, 1, 1], [], []>} : vector<80x128xf32>, vector<128x512xf32>, vector<80x512xf32> -> vector<80x512xf32>
    %c0_3 = arith.constant 0 : index
    %c0_4 = arith.constant 0 : index
    %3 = vector.load %arg4[%c0_3, %c0_4] : memref<1x512xf32, #tpu.memory_space<vmem>>, vector<1x512xf32>
    %4 = vector.broadcast %3 : vector<1x512xf32> to vector<80x512xf32>
    %5 = arith.addf %2, %4 : vector<80x512xf32>
    %c0_5 = arith.constant 0 : index
    %c0_6 = arith.constant 0 : index
    %6 = vector.load %arg5[%c0_5, %c0_6] : memref<80x512xf32, #tpu.memory_space<vmem>>, vector<80x512xf32>
    tpu.vector_store %arg5[%c0_5, %c0_6], %5 {strides = array<i32>} : memref<80x512xf32, #tpu.memory_space<vmem>>, vector<80x512xf32>,
    return
  }
  func.func @transform_0(%arg0: i32, %arg1: i32) -> (i32, i32) {
    %c0_i32 = arith.constant 0 : i32
    %c0_i32_0 = arith.constant 0 : i32
    return %arg1, %c0_i32 : i32, i32
  }
  func.func @transform_1(%arg0: i32, %arg1: i32) -> (i32, i32) {
    %c0_i32 = arith.constant 0 : i32
    %c0_i32_0 = arith.constant 0 : i32
    return %c0_i32, %arg0 : i32, i32
  }
  func.func @transform_2(%arg0: i32, %arg1: i32) -> (i32, i32) {
    %c0_i32 = arith.constant 0 : i32
    %c0_i32_0 = arith.constant 0 : i32
    return %c0_i32, %arg0 : i32, i32
  }
  func.func @transform_3(%arg0: i32, %arg1: i32) -> (i32, i32) {
    %c0_i32 = arith.constant 0 : i32
    return %arg1, %arg0 : i32, i32
  }
}

</mosaic_0001>

<bundles_post_ra>
// kernel: tpu_custom_call.1
= control target key start
LH: loop header
LB: loop body
LE: loop exit
PB: predicated region body
PF: predicated region fallthrough
CT: control target
= control target key end

     0   :  { %8 = vsyncpa [#allocation3], 0  ;;  %s732_s0 = inlined_call_operand.hbm [shape: f32[80,128], index: 0, kind: input, shape index: {}]   ;;  %s733_s1 = inlined_call_operand.hbm [shape: f32[128,512], index: 1, kind: input, shape index: {}]   ;;  %s734_s2 = inlined_call_operand.vmem [shape: f32[1,512], index: 2, kind: input, shape index: {}]   ;;  %s735_s3 = inlined_call_operand.hbm [shape: f32[80,512], index: 3, kind: output, shape index: {}]  }
   0x1   :  { %9 = vsyncpa [#allocation6], 0 }
   0x2   :  { %10 = vsyncpa [#allocation4], 0  ;;  %s591_s12 = smov [#allocation2]   ;;  %s519_s16 = scalar_lea.hbm %s732_s0, 1280 }
   0x3   :  { %s16_s13 = sshll.u32 %s591_s12, 4  ;;  %p520_p0 = scmp.ne.s32.totalorder %s732_s0, %s519_s16  ;;  %s17_s13 = int_to_ptr.vmem [resolvable:$true] %s16_s13 }
   0x4   :  { %p523_p1 = scmp.lt.u32.totalorder %s519_s16, %s732_s0 }
   0x6   :  { %p525_p2 = pnand %p523_p1, %p520_p0 }
   0x8   :  { %528 = shalt.err (!%p525_p2)
}
   0x9   :  { %s529_s21 = scalar_lea.vmem %s17_s13, 1280  ;;  %p534_p4 = scmp.lt.s32.totalorder %s17_s13, %s17_s13 }
   0xa   :  { %p530_p3 = scmp.ne.s32.totalorder %s17_s13, %s529_s21  ;;  %p535_p5 = scmp.lt.s32.totalorder %s529_s21, %s529_s21 }
   0xc   :  { %p536_p6 = por %p535_p5, %p534_p4 }
   0xe   :  { %p537_p7 = pnand %p536_p6, %p530_p3 }
  0x10   :  { %540 = shalt.err (!%p537_p7)
}
  0x11   :  { %s592_s22 = smov 128   ;;  %s593_s23 = smov 8  }
  0x12   :  { %22 = dma.hbm_to_vmem [thread:$0]  %s732_s0, 1280, %s17_s13, [#allocation3], %s592_s22, %s592_s22, %s593_s23  }
  0x13   :  { %s594_s26 = smov [#allocation5]   ;;  %s541_s30 = scalar_lea.hbm %s733_s1, 8192 }
  0x14   :  { %s28_s27 = sshll.u32 %s594_s26, 4  ;;  %p542_p8 = scmp.ne.s32.totalorder %s733_s1, %s541_s30  ;;  %s29_s27 = int_to_ptr.vmem [resolvable:$true] %s28_s27 }
  0x15   :  { %p545_p9 = scmp.lt.u32.totalorder %s541_s30, %s733_s1 }
  0x17   :  { %p547_p10 = pnand %p545_p9, %p542_p8 }
  0x19   :  { %550 = shalt.err (!%p547_p10)
}
  0x1a   :  { %s551_s8 = scalar_lea.vmem %s29_s27, 8192  ;;  %p556_p12 = scmp.lt.s32.totalorder %s29_s27, %s29_s27 }
  0x1b   :  { %p552_p11 = scmp.ne.s32.totalorder %s29_s27, %s551_s8  ;;  %p557_p13 = scmp.lt.s32.totalorder %s551_s8, %s551_s8 }
  0x1d   :  { %p558_p0 = por %p557_p13, %p556_p12 }
  0x1f   :  { %p559_p1 = pnand %p558_p0, %p552_p11 }
  0x21   :  { %562 = shalt.err (!%p559_p1)
}
  0x22   :  { %s595_s0 = smov 512   ;;  %s596_s9 = smov 32  }
  0x23   :  { %34 = dma.hbm_to_vmem [thread:$0]  %s733_s1, 8192, %s29_s27, [#allocation6], %s595_s0, %s595_s0, %s596_s9  }
  0x24   :  { %585 = dma.done.wait [#allocation3], 1280  }
  0x25   :  { %586 = vsyncadd [#allocation3], 4294966016 }
  0x26   :  { %587 = dma.done.wait [#allocation6], 8192  }
  0x27   :  { %588 = vsyncadd [#allocation6], 4294959104  ;;  %v597_v0 = vmov 0.0   ;;  %v54_v1 = vld [vmem:[#allocation5 + $0x8] sm:$0xff]  ;;  %v56_v3 = vld [vmem:[#allocation5 + $0x18] sm:$0xff] }
  0x28   :  { %203 = vmatprep.mubr.f32.mxu0 %v597_v0  ;;  %328 = vmatprep.mubr.f32.mxu1 %v597_v0  ;;  %v58_v2 = vld [vmem:[#allocation5 + $0x28] sm:$0xff]  ;;  %v60_v5 = vld [vmem:[#allocation5 + $0x38] sm:$0xff]  ;;  %v53_v6 = vld [vmem:[#allocation5] sm:$0xff] }
  0x29   :  { %v447_v4 = vpack.c.bf16 %v58_v2, %v54_v1  ;;  %v57_v7 = vld [vmem:[#allocation5 + $0x20] sm:$0xff]  ;;  %v479_v8 = vpack.c.bf16 %v60_v5, %v56_v3  ;;  %v55_v10 = vld [vmem:[#allocation5 + $0x10] sm:$0xff]  ;;  %v62_v12 = vld [vmem:[#allocation5 + $0x48] sm:$0xff] }
  0x2a   :  { %v449_v9 = vpack.c.bf16 %v57_v7, %v53_v6  ;;  %v59_v11 = vld [vmem:[#allocation5 + $0x30] sm:$0xff]  ;;  %v66_v14 = vld [vmem:[#allocation5 + $0x68] sm:$0xff]  ;;  %v64_v15 = vld [vmem:[#allocation5 + $0x58] sm:$0xff] }
  0x2b   :  { %448 = vmatprep.subr.bf16.mxu0 %v447_v4  ;;  %v481_v13 = vpack.c.bf16 %v59_v11, %v55_v10  ;;  %v68_v16 = vld [vmem:[#allocation5 + $0x78] sm:$0xff]  ;;  %480 = vmatprep.subr.bf16.mxu1 %v479_v8  ;;  %v451_v17 = vpack.c.bf16 %v66_v14, %v62_v12  ;;  %v61_v19 = vld [vmem:[#allocation5 + $0x40] sm:$0xff]  ;;  %v63_v21 = vld [vmem:[#allocation5 + $0x50] sm:$0xff] }
  0x2c   :  { %450 = vmatpush1.bf16.msra.mxu0 %v449_v9  ;;  %v483_v18 = vpack.c.bf16 %v68_v16, %v64_v15  ;;  %v65_v20 = vld [vmem:[#allocation5 + $0x60] sm:$0xff]  ;;  %v67_v23 = vld [vmem:[#allocation5 + $0x70] sm:$0xff]  ;;  %v70_v24 = vld [vmem:[#allocation5 + $0x88] sm:$0xff] }
  0x2d   :  { %482 = vmatpush1.bf16.msra.mxu1 %v481_v13  ;;  %v453_v22 = vpack.c.bf16 %v65_v20, %v61_v19  ;;  %v74_v25 = vld [vmem:[#allocation5 + $0xa8] sm:$0xff]  ;;  %452 = vmatprep.subr.bf16.mxu0 %v451_v17  ;;  %v485_v26 = vpack.c.bf16 %v67_v23, %v63_v21  ;;  %v72_v28 = vld [vmem:[#allocation5 + $0x98] sm:$0xff]  ;;  %v69_v30 = vld [vmem:[#allocation5 + $0x80] sm:$0xff] }
  0x2e   :  { %484 = vmatprep.subr.bf16.mxu1 %v483_v18  ;;  %v455_v27 = vpack.c.bf16 %v74_v25, %v70_v24  ;;  %v76_v29 = vld [vmem:[#allocation5 + $0xb8] sm:$0xff]  ;;  %v73_v32 = vld [vmem:[#allocation5 + $0xa0] sm:$0xff]  ;;  %v71_v33 = vld [vmem:[#allocation5 + $0x90] sm:$0xff] }
  0x2f   :  { %v487_v31 = vpack.c.bf16 %v76_v29, %v72_v28  ;;  %v75_v34 = vld [vmem:[#allocation5 + $0xb0] sm:$0xff]  ;;  %v457_v35 = vpack.c.bf16 %v73_v32, %v69_v30  ;;  %v78_v36 = vld [vmem:[#allocation5 + $0xc8] sm:$0xff]  ;;  %v80_v38 = vld [vmem:[#allocation5 + $0xd8] sm:$0xff] }
  0x30   :  { %454 = vmatpush1.bf16.msra.mxu0 %v453_v22  ;;  %v82_v37 = vld [vmem:[#allocation5 + $0xe8] sm:$0xff]  ;;  %v489_v39 = vpack.c.bf16 %v75_v34, %v71_v33  ;;  %v84_v41 = vld [vmem:[#allocation5 + $0xf8] sm:$0xff]  ;;  %v77_v42 = vld [vmem:[#allocation5 + $0xc0] sm:$0xff] }
  0x31   :  { %486 = vmatpush1.bf16.msra.mxu1 %v485_v26  ;;  %456 = vmatprep.subr.bf16.mxu0 %v455_v27  ;;  %v459_v40 = vpack.c.bf16 %v82_v37, %v78_v36  ;;  %v81_v43 = vld [vmem:[#allocation5 + $0xe0] sm:$0xff]  ;;  %v491_v44 = vpack.c.bf16 %v84_v41, %v80_v38  ;;  %v79_v45 = vld [vmem:[#allocation5 + $0xd0] sm:$0xff]  ;;  %v86_v47 = vld [vmem:[#allocation5 + $0x108] sm:$0xff] }
  0x32   :  { %488 = vmatprep.subr.bf16.mxu1 %v487_v31  ;;  %v83_v46 = vld [vmem:[#allocation5 + $0xf0] sm:$0xff]  ;;  %v90_v48 = vld [vmem:[#allocation5 + $0x128] sm:$0xff]  ;;  %v88_v49 = vld [vmem:[#allocation5 + $0x118] sm:$0xff]  ;;  %v461_v51 = vpack.c.bf16 %v81_v43, %v77_v42 }
  0x33   :  { %v92_v50 = vld [vmem:[#allocation5 + $0x138] sm:$0xff]  ;;  %v493_v52 = vpack.c.bf16 %v83_v46, %v79_v45  ;;  %v463_v53 = vpack.c.bf16 %v90_v48, %v86_v47  ;;  %v85_v54 = vld [vmem:[#allocation5 + $0x100] sm:$0xff]  ;;  %v87_v56 = vld [vmem:[#allocation5 + $0x110] sm:$0xff] }
  0x34   :  { %458 = vmatpush1.bf16.msra.mxu0 %v457_v35  ;;  %v89_v55 = vld [vmem:[#allocation5 + $0x120] sm:$0xff]  ;;  %v495_v57 = vpack.c.bf16 %v92_v50, %v88_v49  ;;  %v91_v58 = vld [vmem:[#allocation5 + $0x130] sm:$0xff]  ;;  %v94_v59 = vld [vmem:[#allocation5 + $0x148] sm:$0xff] }
  0x35   :  { %490 = vmatpush1.bf16.msra.mxu1 %v489_v39  ;;  %460 = vmatprep.subr.bf16.mxu0 %v459_v40  ;;  %v98_v60 = vld [vmem:[#allocation5 + $0x168] sm:$0xff]  ;;  %v96_v61 = vld [vmem:[#allocation5 + $0x158] sm:$0xff]  ;;  %v465_v63 = vpack.c.bf16 %v89_v55, %v85_v54  ;;  %v497_v1 = vpack.c.bf16 %v91_v58, %v87_v56  ;;  %v93_v3 = vld [vmem:[#allocation5 + $0x140] sm:$0xff] }
  0x36   :  { %492 = vmatprep.subr.bf16.mxu1 %v491_v44  ;;  %v100_v62 = vld [vmem:[#allocation5 + $0x178] sm:$0xff]  ;;  %v467_v2 = vpack.c.bf16 %v98_v60, %v94_v59  ;;  %v97_v4 = vld [vmem:[#allocation5 + $0x160] sm:$0xff]  ;;  %v95_v5 = vld [vmem:[#allocation5 + $0x150] sm:$0xff]  ;;  %v119_v44 = vlaneseq }
  0x37   :  { %v499_v6 = vpack.c.bf16 %v100_v62, %v96_v61  ;;  %v99_v7 = vld [vmem:[#allocation5 + $0x170] sm:$0xff]  ;;  %v102_v8 = vld [vmem:[#allocation5 + $0x188] sm:$0xff]  ;;  %v104_v10 = vld [vmem:[#allocation5 + $0x198] sm:$0xff]  ;;  %v469_v12 = vpack.c.bf16 %v97_v4, %v93_v3 }
  0x38   :  { %462 = vmatpush1.bf16.msra.mxu0 %v461_v51  ;;  %v106_v9 = vld [vmem:[#allocation5 + $0x1a8] sm:$0xff]  ;;  %v108_v11 = vld [vmem:[#allocation5 + $0x1b8] sm:$0xff]  ;;  %v501_v13 = vpack.c.bf16 %v99_v7, %v95_v5  ;;  %v101_v15 = vld [vmem:[#allocation5 + $0x180] sm:$0xff]  ;;  %v120_v45 = vshrl.u32 %v119_v44, 7 }
  0x39   :  { %494 = vmatpush1.bf16.msra.mxu1 %v493_v52  ;;  %464 = vmatprep.subr.bf16.mxu0 %v463_v53  ;;  %v471_v14 = vpack.c.bf16 %v106_v9, %v102_v8  ;;  %v105_v16 = vld [vmem:[#allocation5 + $0x1a0] sm:$0xff]  ;;  %v103_v17 = vld [vmem:[#allocation5 + $0x190] sm:$0xff]  ;;  %v503_v18 = vpack.c.bf16 %v108_v11, %v104_v10  ;;  %v110_v20 = vld [vmem:[#allocation5 + $0x1c8] sm:$0xff] }
  0x3a   :  { %496 = vmatprep.subr.bf16.mxu1 %v495_v57  ;;  %v107_v19 = vld [vmem:[#allocation5 + $0x1b0] sm:$0xff]  ;;  %v114_v21 = vld [vmem:[#allocation5 + $0x1e8] sm:$0xff]  ;;  %v112_v22 = vld [vmem:[#allocation5 + $0x1d8] sm:$0xff]  ;;  %v473_v24 = vpack.c.bf16 %v105_v16, %v101_v15  ;;  %v121_v46 = vsub.s32 0, %v120_v45  ;;  %v129_v48 = vsub.s32 2, %v120_v45  ;;  %v125_v49 = vsub.s32 1, %v120_v45 }
  0x3b   :  { %v116_v23 = vld [vmem:[#allocation5 + $0x1f8] sm:$0xff]  ;;  %v505_v25 = vpack.c.bf16 %v107_v19, %v103_v17  ;;  %v475_v26 = vpack.c.bf16 %v114_v21, %v110_v20  ;;  %v109_v27 = vld [vmem:[#allocation5 + $0x1c0] sm:$0xff]  ;;  %v111_v30 = vld [vmem:[#allocation5 + $0x1d0] sm:$0xff]  ;;  %v133_v50 = vsub.s32 3, %v120_v45 }
  0x3c   :  { %466 = vmatpush1.bf16.msra.mxu0 %v465_v63  ;;  %v113_v28 = vld [vmem:[#allocation5 + $0x1e0] sm:$0xff]  ;;  %v507_v29 = vpack.c.bf16 %v116_v23, %v112_v22  ;;  %v115_v31 = vld [vmem:[#allocation5 + $0x1f0] sm:$0xff]  ;;  %v44_v35 = vld [vmem:[#allocation2 + $0x8] sm:$0xff] }
  0x3d   :  { %498 = vmatpush1.bf16.msra.mxu1 %v497_v1  ;;  %468 = vmatprep.subr.bf16.mxu0 %v467_v2  ;;  %v477_v32 = vpack.c.bf16 %v113_v28, %v109_v27  ;;  %v509_v33 = vpack.c.bf16 %v115_v31, %v111_v30  ;;  %v43_v34 = vld [vmem:[#allocation2] sm:$0xff]  ;;  %v45_v36 = vld [vmem:[#allocation2 + $0x10] sm:$0xff]  ;;  %v46_v37 = vld [vmem:[#allocation2 + $0x18] sm:$0xff] }
  0x3e   :  { %500 = vmatprep.subr.bf16.mxu1 %v499_v6  ;;  %v47_v38 = vld [vmem:[#allocation2 + $0x20] sm:$0xff]  ;;  %v48_v39 = vld [vmem:[#allocation2 + $0x28] sm:$0xff]  ;;  %v49_v40 = vld [vmem:[#allocation2 + $0x30] sm:$0xff] }
  0x3f   :  { %v50_v41 = vld [vmem:[#allocation2 + $0x38] sm:$0xff]  ;;  %v51_v42 = vld [vmem:[#allocation2 + $0x40] sm:$0xff]  ;;  %v52_v43 = vld [vmem:[#allocation2 + $0x48] sm:$0xff] }
  0x40   :  { %470 = vmatpush1.bf16.msra.mxu0 %v469_v12  ;;  %v117_v47 = vld [vmem:[%s734_s2] sm:$0xf]  ;;  %s598_s2 = smov [#allocation7]  }
  0x41   :  { %502 = vmatpush1.bf16.msra.mxu1 %v501_v13  ;;  %472 = vmatprep.subr.bf16.mxu0 %v471_v14  ;;  %v669_v51 = vrot.slane %v117_v47, %v121_v46  ;;  %v671_v52 = vrot.slane %v117_v47, %v129_v48  ;;  %v673_v53 = vrot.slane %v117_v47, %v125_v49  ;;  %s434_s13 = sshll.u32 %s598_s2, 4  ;;  %s435_s13 = int_to_ptr.vmem [resolvable:$true] %s434_s13 }
  0x42   :  { %504 = vmatprep.subr.bf16.mxu1 %v503_v18  ;;  %v675_v54 = vrot.slane %v117_v47, %v133_v50  ;;  %s563_s14 = scalar_lea.vmem %s435_s13, 5120  ;;  %p568_p3 = scmp.lt.s32.totalorder %s435_s13, %s435_s13 }
  0x43   :  { %p564_p2 = scmp.ne.s32.totalorder %s435_s13, %s563_s14  ;;  %p569_p4 = scmp.lt.s32.totalorder %s563_s14, %s563_s14 }
  0x44   :  { %474 = vmatpush1.bf16.msra.mxu0 %v473_v24 }
  0x45   :  { %506 = vmatpush1.bf16.msra.mxu1 %v505_v25  ;;  %476 = vmatprep.subr.bf16.mxu0 %v475_v26  ;;  %p570_p5 = por %p569_p4, %p568_p3 }
  0x46   :  { %508 = vmatprep.subr.bf16.mxu1 %v507_v29 }
  0x47   :  { %p571_p6 = pnand %p570_p5, %p564_p2 }
  0x48   :  { %478 = vmatpush1.bf16.msra.mxu0 %v477_v32 }
  0x49   :  { %510 = vmatpush1.bf16.msra.mxu1 %v509_v33 }
  0x4b   :  { %204 = vmatmul.mubr.f32.vlgmr.msra.gmra.mrb[0].mxu0 %v43_v34 }
  0x4c   :  { %329 = vmatmul.mubr.f32.vlgmr.msra.gmra.mrb[0].mxu1 %v43_v34  ;;  %209 = vmatprep.mubr.f32.mxu0 %v597_v0 }
  0x4d   :  { %334 = vmatprep.mubr.f32.mxu1 %v597_v0 }
  0x4f   :  { %210 = vmatmul.mubr.f32.gmra.mrb[2].mxu0 %v44_v35 }
  0x50   :  { %335 = vmatmul.mubr.f32.gmra.mrb[2].mxu1 %v44_v35  ;;  %215 = vmatprep.mubr.f32.mxu0 %v597_v0 }
  0x51   :  { %340 = vmatprep.mubr.f32.mxu1 %v597_v0 }
  0x53   :  { %216 = vmatmul.mubr.f32.gmra.mrb[4].mxu0 %v45_v36 }
  0x54   :  { %341 = vmatmul.mubr.f32.gmra.mrb[4].mxu1 %v45_v36  ;;  %221 = vmatprep.mubr.f32.mxu0 %v597_v0 }
  0x55   :  { %346 = vmatprep.mubr.f32.mxu1 %v597_v0 }
  0x57   :  { %222 = vmatmul.mubr.f32.gmra.mrb[6].mxu0 %v46_v37 }
  0x58   :  { %347 = vmatmul.mubr.f32.gmra.mrb[6].mxu1 %v46_v37  ;;  %227 = vmatprep.mubr.f32.mxu0 %v597_v0 }
  0x59   :  { %352 = vmatprep.mubr.f32.mxu1 %v597_v0 }
  0x5b   :  { %228 = vmatmul.mubr.f32.gmra.mrb[8].mxu0 %v47_v38 }
  0x5c   :  { %353 = vmatmul.mubr.f32.gmra.mrb[8].mxu1 %v47_v38  ;;  %233 = vmatprep.mubr.f32.mxu0 %v597_v0 }
  0x5d   :  { %358 = vmatprep.mubr.f32.mxu1 %v597_v0 }
  0x5f   :  { %234 = vmatmul.mubr.f32.gmra.mrb[10].mxu0 %v48_v39 }
  0x60   :  { %359 = vmatmul.mubr.f32.gmra.mrb[10].mxu1 %v48_v39  ;;  %239 = vmatprep.mubr.f32.mxu0 %v597_v0 }
  0x61   :  { %364 = vmatprep.mubr.f32.mxu1 %v597_v0 }
  0x63   :  { %240 = vmatmul.mubr.f32.gmra.mrb[12].mxu0 %v49_v40 }
  0x64   :  { %365 = vmatmul.mubr.f32.gmra.mrb[12].mxu1 %v49_v40  ;;  %245 = vmatprep.mubr.f32.mxu0 %v597_v0 }
  0x65   :  { %370 = vmatprep.mubr.f32.mxu1 %v597_v0 }
  0x67   :  { %246 = vmatmul.mubr.f32.gmra.mrb[14].mxu0 %v50_v41 }
  0x68   :  { %371 = vmatmul.mubr.f32.gmra.mrb[14].mxu1 %v50_v41  ;;  %251 = vmatprep.mubr.f32.mxu0 %v597_v0 }
  0x69   :  { %376 = vmatprep.mubr.f32.mxu1 %v597_v0 }
  0x6b   :  { %252 = vmatmul.mubr.f32.gmra.mrb[16].mxu0 %v51_v42 }
  0x6c   :  { %377 = vmatmul.mubr.f32.gmra.mrb[16].mxu1 %v51_v42  ;;  %257 = vmatprep.mubr.f32.mxu0 %v597_v0 }
  0x6d   :  { %382 = vmatprep.mubr.f32.mxu1 %v597_v0 }
  0x6f   :  { %258 = vmatmul.mubr.f32.gmra.mrb[18].mxu0 %v52_v43 }
  0x70   :  { %383 = vmatmul.mubr.f32.gmra.mrb[18].mxu1 %v52_v43 }
 0x11e   :  { %v205_v0 = vpop.f32.mrb[0].mxu0 }
 0x11f   :  { %v206_v55 = vadd.f32 %v205_v0, %v669_v51  ;;  %v330_v56 = vpop.f32.mrb[0].mxu1  ;;  %v207_v57 = vpop.f32.mrb[1].mxu0 }
 0x120   :  { %v331_v58 = vadd.f32 %v330_v56, %v671_v52  ;;  %v208_v59 = vadd.f32 %v207_v57, %v673_v53  ;;  %v332_v60 = vpop.f32.mrb[1].mxu1 }
 0x121   :  { %389 = vst [vmem:[#allocation7] sm:$0xff] %v206_v55  ;;  %v333_v61 = vadd.f32 %v332_v60, %v675_v54 }
 0x122   :  { %391 = vst [vmem:[#allocation7 + $0x10] sm:$0xff] %v331_v58  ;;  %390 = vst [vmem:[#allocation7 + $0x8] sm:$0xff] %v208_v59  ;;  %v211_v62 = vpop.f32.mrb[2].mxu0 }
 0x123   :  { %392 = vst [vmem:[#allocation7 + $0x18] sm:$0xff] %v333_v61  ;;  %v212_v63 = vadd.f32 %v211_v62, %v669_v51  ;;  %v336_v1 = vpop.f32.mrb[2].mxu1  ;;  %v213_v2 = vpop.f32.mrb[3].mxu0 }
 0x124   :  { %v337_v3 = vadd.f32 %v336_v1, %v671_v52  ;;  %v214_v4 = vadd.f32 %v213_v2, %v673_v53  ;;  %v338_v5 = vpop.f32.mrb[3].mxu1 }
 0x125   :  { %393 = vst [vmem:[#allocation7 + $0x20] sm:$0xff] %v212_v63  ;;  %v339_v6 = vadd.f32 %v338_v5, %v675_v54 }
 0x126   :  { %395 = vst [vmem:[#allocation7 + $0x30] sm:$0xff] %v337_v3  ;;  %394 = vst [vmem:[#allocation7 + $0x28] sm:$0xff] %v214_v4  ;;  %v217_v7 = vpop.f32.mrb[4].mxu0 }
 0x127   :  { %396 = vst [vmem:[#allocation7 + $0x38] sm:$0xff] %v339_v6  ;;  %v218_v8 = vadd.f32 %v217_v7, %v669_v51  ;;  %v342_v9 = vpop.f32.mrb[4].mxu1  ;;  %v219_v10 = vpop.f32.mrb[5].mxu0 }
 0x128   :  { %v343_v11 = vadd.f32 %v342_v9, %v671_v52  ;;  %v220_v12 = vadd.f32 %v219_v10, %v673_v53  ;;  %v344_v13 = vpop.f32.mrb[5].mxu1 }
 0x129   :  { %397 = vst [vmem:[#allocation7 + $0x40] sm:$0xff] %v218_v8  ;;  %v345_v14 = vadd.f32 %v344_v13, %v675_v54 }
 0x12a   :  { %399 = vst [vmem:[#allocation7 + $0x50] sm:$0xff] %v343_v11  ;;  %398 = vst [vmem:[#allocation7 + $0x48] sm:$0xff] %v220_v12  ;;  %v223_v15 = vpop.f32.mrb[6].mxu0 }
 0x12b   :  { %400 = vst [vmem:[#allocation7 + $0x58] sm:$0xff] %v345_v14  ;;  %v224_v16 = vadd.f32 %v223_v15, %v669_v51  ;;  %v348_v17 = vpop.f32.mrb[6].mxu1  ;;  %v225_v18 = vpop.f32.mrb[7].mxu0 }
 0x12c   :  { %v349_v19 = vadd.f32 %v348_v17, %v671_v52  ;;  %v226_v20 = vadd.f32 %v225_v18, %v673_v53  ;;  %v350_v21 = vpop.f32.mrb[7].mxu1 }
 0x12d   :  { %401 = vst [vmem:[#allocation7 + $0x60] sm:$0xff] %v224_v16  ;;  %v351_v22 = vadd.f32 %v350_v21, %v675_v54 }
 0x12e   :  { %403 = vst [vmem:[#allocation7 + $0x70] sm:$0xff] %v349_v19  ;;  %402 = vst [vmem:[#allocation7 + $0x68] sm:$0xff] %v226_v20  ;;  %v229_v23 = vpop.f32.mrb[8].mxu0 }
 0x12f   :  { %404 = vst [vmem:[#allocation7 + $0x78] sm:$0xff] %v351_v22  ;;  %v230_v24 = vadd.f32 %v229_v23, %v669_v51  ;;  %v354_v25 = vpop.f32.mrb[8].mxu1  ;;  %v231_v26 = vpop.f32.mrb[9].mxu0 }
 0x130   :  { %v355_v27 = vadd.f32 %v354_v25, %v671_v52  ;;  %v232_v28 = vadd.f32 %v231_v26, %v673_v53  ;;  %v356_v29 = vpop.f32.mrb[9].mxu1 }
 0x131   :  { %405 = vst [vmem:[#allocation7 + $0x80] sm:$0xff] %v230_v24  ;;  %v357_v30 = vadd.f32 %v356_v29, %v675_v54 }
 0x132   :  { %407 = vst [vmem:[#allocation7 + $0x90] sm:$0xff] %v355_v27  ;;  %406 = vst [vmem:[#allocation7 + $0x88] sm:$0xff] %v232_v28  ;;  %v235_v31 = vpop.f32.mrb[10].mxu0 }
 0x133   :  { %408 = vst [vmem:[#allocation7 + $0x98] sm:$0xff] %v357_v30  ;;  %v236_v32 = vadd.f32 %v235_v31, %v669_v51  ;;  %v360_v33 = vpop.f32.mrb[10].mxu1  ;;  %v237_v34 = vpop.f32.mrb[11].mxu0 }
 0x134   :  { %v361_v35 = vadd.f32 %v360_v33, %v671_v52  ;;  %v238_v36 = vadd.f32 %v237_v34, %v673_v53  ;;  %v362_v37 = vpop.f32.mrb[11].mxu1 }
 0x135   :  { %409 = vst [vmem:[#allocation7 + $0xa0] sm:$0xff] %v236_v32  ;;  %v363_v38 = vadd.f32 %v362_v37, %v675_v54 }
 0x136   :  { %411 = vst [vmem:[#allocation7 + $0xb0] sm:$0xff] %v361_v35  ;;  %410 = vst [vmem:[#allocation7 + $0xa8] sm:$0xff] %v238_v36  ;;  %v241_v39 = vpop.f32.mrb[12].mxu0 }
 0x137   :  { %412 = vst [vmem:[#allocation7 + $0xb8] sm:$0xff] %v363_v38  ;;  %v242_v40 = vadd.f32 %v241_v39, %v669_v51  ;;  %v366_v41 = vpop.f32.mrb[12].mxu1  ;;  %v243_v42 = vpop.f32.mrb[13].mxu0 }
 0x138   :  { %v367_v43 = vadd.f32 %v366_v41, %v671_v52  ;;  %v244_v44 = vadd.f32 %v243_v42, %v673_v53  ;;  %v368_v45 = vpop.f32.mrb[13].mxu1 }
 0x139   :  { %413 = vst [vmem:[#allocation7 + $0xc0] sm:$0xff] %v242_v40  ;;  %v369_v46 = vadd.f32 %v368_v45, %v675_v54 }
 0x13a   :  { %415 = vst [vmem:[#allocation7 + $0xd0] sm:$0xff] %v367_v43  ;;  %414 = vst [vmem:[#allocation7 + $0xc8] sm:$0xff] %v244_v44  ;;  %v247_v47 = vpop.f32.mrb[14].mxu0 }
 0x13b   :  { %416 = vst [vmem:[#allocation7 + $0xd8] sm:$0xff] %v369_v46  ;;  %v248_v48 = vadd.f32 %v247_v47, %v669_v51  ;;  %v372_v49 = vpop.f32.mrb[14].mxu1  ;;  %v249_v50 = vpop.f32.mrb[15].mxu0 }
 0x13c   :  { %v373_v0 = vadd.f32 %v372_v49, %v671_v52  ;;  %v250_v55 = vadd.f32 %v249_v50, %v673_v53  ;;  %v374_v56 = vpop.f32.mrb[15].mxu1 }
 0x13d   :  { %417 = vst [vmem:[#allocation7 + $0xe0] sm:$0xff] %v248_v48  ;;  %v375_v57 = vadd.f32 %v374_v56, %v675_v54 }
 0x13e   :  { %419 = vst [vmem:[#allocation7 + $0xf0] sm:$0xff] %v373_v0  ;;  %418 = vst [vmem:[#allocation7 + $0xe8] sm:$0xff] %v250_v55  ;;  %v253_v58 = vpop.f32.mrb[16].mxu0 }
 0x13f   :  { %420 = vst [vmem:[#allocation7 + $0xf8] sm:$0xff] %v375_v57  ;;  %v254_v59 = vadd.f32 %v253_v58, %v669_v51  ;;  %v378_v60 = vpop.f32.mrb[16].mxu1  ;;  %v255_v61 = vpop.f32.mrb[17].mxu0 }
 0x140   :  { %v379_v62 = vadd.f32 %v378_v60, %v671_v52  ;;  %v256_v63 = vadd.f32 %v255_v61, %v673_v53  ;;  %v380_v1 = vpop.f32.mrb[17].mxu1 }
 0x141   :  { %421 = vst [vmem:[#allocation7 + $0x100] sm:$0xff] %v254_v59  ;;  %v381_v2 = vadd.f32 %v380_v1, %v675_v54 }
 0x142   :  { %423 = vst [vmem:[#allocation7 + $0x110] sm:$0xff] %v379_v62  ;;  %422 = vst [vmem:[#allocation7 + $0x108] sm:$0xff] %v256_v63  ;;  %v259_v3 = vpop.f32.mrb[18].mxu0 }
 0x143   :  { %424 = vst [vmem:[#allocation7 + $0x118] sm:$0xff] %v381_v2  ;;  %v260_v4 = vadd.f32 %v259_v3, %v669_v51  ;;  %v384_v5 = vpop.f32.mrb[18].mxu1  ;;  %v261_v6 = vpop.f32.mrb[19].mxu0 }
 0x144   :  { %v385_v7 = vadd.f32 %v384_v5, %v671_v52  ;;  %v262_v8 = vadd.f32 %v261_v6, %v673_v53  ;;  %v386_v9 = vpop.f32.mrb[19].mxu1 }
 0x145   :  { %425 = vst [vmem:[#allocation7 + $0x120] sm:$0xff] %v260_v4  ;;  %v387_v10 = vadd.f32 %v386_v9, %v675_v54 }
 0x146   :  { %427 = vst [vmem:[#allocation7 + $0x130] sm:$0xff] %v385_v7  ;;  %426 = vst [vmem:[#allocation7 + $0x128] sm:$0xff] %v262_v8 }
 0x147   :  { %428 = vst [vmem:[#allocation7 + $0x138] sm:$0xff] %v387_v10 }
 0x148   :  { %574 = shalt.err (!%p571_p6)
}
 0x149   :  { %s575_s17 = scalar_lea.hbm %s735_s3, 5120 }
 0x14a   :  { %p576_p7 = scmp.ne.s32.totalorder %s735_s3, %s575_s17  ;;  %p579_p8 = scmp.lt.u32.totalorder %s575_s17, %s735_s3 }
 0x14c   :  { %p581_p9 = pnand %p579_p8, %p576_p7 }
 0x14e   :  { %584 = shalt.err (!%p581_p9)
}
 0x14f   :  { %440 = dma.vmem_to_hbm [thread:$0]  %s435_s13, 5120, %s735_s3, [#allocation4], %s595_s0, %s595_s0, %s596_s9  }
 0x150   :  { %589 = dma.done.wait [#allocation4], 5120  }
 0x151   :  { %590 = vsyncadd [#allocation4], 4294962176 }
 0x152   :  { %444 = vsyncpa [#allocation3], 1 }
 0x153   :  { %445 = vsyncpa [#allocation6], 1 }
 0x154   :  { %446 = vsyncpa [#allocation4], 1 }

</bundles_post_ra>
